<compile_context>
chip_gen: v7x
topology: tpu7x:2x2x1
jax: 0.10.0
libtpu: 0.0.40
codegen_flags: <defaults>
</compile_context>

<pallas_src>
import jax
import jax.numpy as jnp
import numpy as np
from jax import lax
from jax.experimental import pallas as pl
from jax.experimental.pallas import tpu as pltpu

# ----------------------------- problem sizes --------------------------------
VOCAB = 20          # cand_vocab_size
EMB = 32            # embedding_size
NFILT = 16          # num_filters
B = 2               # batch
S = 8               # sequence length
BS = B * S
FEAT = 3 * NFILT    # concatenated conv features (48)

# Masking below uses `row & (S - 1)`; guard the power-of-two assumption.
assert S > 0 and (S & (S - 1)) == 0, "S must be a power of two (uses & (S-1))"

# ------------------------- packed-parameter layout ---------------------------
GRP = 128                 # lane-aligned width of each conv-offset group
VPAD = 24                 # vocab rows padded to a sublane multiple (3 * 8)
R_BCONV = VPAD            # row 24: conv biases  [b1|b2|b3|0...] in lanes 0:48
R_BL1 = VPAD + 1          # row 25: l1 bias in lanes 0:EMB
R_BL2 = VPAD + 2          # row 26: l2 bias
R_BL3 = VPAD + 3          # row 27: l3 bias
R_WL1 = 32                # rows  32:160 : l1 weight, zero-padded to (128, EMB)
R_WL2 = R_WL1 + GRP       # rows 160:192 : l2 weight (EMB, EMB)
R_WL3 = R_WL2 + EMB       # rows 192:224 : l3 weight (EMB, EMB)
NROWS = R_WL3 + EMB       # 224 total rows  (224 x 384 f32 ~ 344 KiB VMEM)


# ------------------------------- kernel -------------------------------------
def cnn_kernel(cand_ref,   # VMEM (BS, 1) int32 token ids
               par_ref,    # VMEM (NROWS, 3*GRP) packed parameters
               out_ref):   # VMEM (B, EMB) output
    # ---- 1) embedding lookup + all three convs as ONE MXU matmul ------------
    # one-hot(ids) @ (emb @ wcat) == gather(emb, ids) @ wcat, done exactly.
    ids = cand_ref[...]                                             # (BS, 1)
    col = lax.broadcasted_iota(jnp.int32, (BS, VPAD), 1)
    onehot = (col == ids).astype(jnp.float32)                       # (BS, 24)
    wfold = par_ref[0:VPAD, :]                                      # (24, 384)
    p = jnp.dot(onehot, wfold, preferred_element_type=jnp.float32)  # (BS, 384)

    # ---- 2) conv offset adds: sublane rolls + lane-aligned 128-wide groups --
    # Group g of p holds, per row r, emb[r] @ w_k[g] for every conv k with
    # kernel size > g (zero columns elsewhere).  pre[r] = sum_g p[r+g, group g].
    g1 = pltpu.roll(p[:, GRP:2 * GRP], shift=BS - 1, axis=0)   # rows shifted by +1
    g2 = pltpu.roll(p[:, 2 * GRP:3 * GRP], shift=BS - 2, axis=0)  # shifted by +2
    pre = p[:, 0:GRP] + g1 + g2                                # (BS, 128)
    pre = jnp.maximum(pre + par_ref[R_BCONV:R_BCONV + 1, 0:GRP], 0.0)

    # ---- 3) mask invalid/wrapped window positions, per-batch max-pool -------
    # Row r = b*S + s is a valid conv-k position iff s <= S - k.  Masking to 0
    # AFTER ReLU cannot change the max: every valid post-ReLU value is >= 0.
    lane = lax.broadcasted_iota(jnp.int32, (BS, GRP), 1)
    row = lax.broadcasted_iota(jnp.int32, (BS, GRP), 0)
    thresh = (S - 1) - (lane >> 4)      # lanes 0:16 -> 7, 16:32 -> 6, 32:48 -> 5
    s_idx = row & (S - 1)               # row % S (S is a power of two, asserted)
    pre = jnp.where(s_idx <= thresh, pre, 0.0)

    feat = jnp.concatenate(
        [jnp.max(pre[b * S:(b + 1) * S, :], axis=0, keepdims=True)
         for b in range(B)],
        axis=0)                                                # (B, 128); lanes 48: are 0

    # ---- 4) MLP head ---------------------------------------------------------
    wl1 = par_ref[R_WL1:R_WL1 + GRP, 0:EMB]     # (128, 32), rows 48:128 are 0
    wl2 = par_ref[R_WL2:R_WL2 + EMB, 0:EMB]     # (32, 32)
    wl3 = par_ref[R_WL3:R_WL3 + EMB, 0:EMB]     # (32, 32)
    bl1 = par_ref[R_BL1:R_BL1 + 1, 0:EMB]
    bl2 = par_ref[R_BL2:R_BL2 + 1, 0:EMB]
    bl3 = par_ref[R_BL3:R_BL3 + 1, 0:EMB]

    h = jnp.maximum(jnp.dot(feat, wl1, preferred_element_type=jnp.float32) + bl1, 0.0)
    h = jnp.maximum(jnp.dot(h, wl2, preferred_element_type=jnp.float32) + bl2, 0.0)
    h = jnp.maximum(jnp.dot(h, wl3, preferred_element_type=jnp.float32) + bl3, 0.0)
    out_ref[...] = h


# ------------------------------ wrapper --------------------------------------
def pack_params(params):
    """One-time host-side packing of all parameters into ONE lane-dense buffer."""
    f = NFILT
    emb = np.asarray(params["embedding"], np.float32)            # (VOCAB, EMB)
    w1 = np.asarray(params["w1"], np.float32)                    # (1, E, F)
    w2 = np.asarray(params["w2"], np.float32)                    # (2, E, F)
    w3 = np.asarray(params["w3"], np.float32)                    # (3, E, F)

    # Three zero-padded, 128-lane conv-offset groups.
    wcat = np.zeros((EMB, 3 * GRP), np.float32)
    wcat[:, 0 * f:1 * f] = w1[0]
    wcat[:, 1 * f:2 * f] = w2[0]
    wcat[:, 2 * f:3 * f] = w3[0]
    wcat[:, GRP + 1 * f:GRP + 2 * f] = w2[1]
    wcat[:, GRP + 2 * f:GRP + 3 * f] = w3[1]
    wcat[:, 2 * GRP + 2 * f:2 * GRP + 3 * f] = w3[2]

    buf = np.zeros((NROWS, 3 * GRP), np.float32)
    buf[0:VOCAB, :] = emb @ wcat                                 # folded table
    buf[R_BCONV, 0 * f:1 * f] = np.asarray(params["b1"])[0]
    buf[R_BCONV, 1 * f:2 * f] = np.asarray(params["b2"])[0]
    buf[R_BCONV, 2 * f:3 * f] = np.asarray(params["b3"])[0]
    buf[R_BL1, 0:EMB] = np.asarray(params["bl1"])[0]
    buf[R_BL2, 0:EMB] = np.asarray(params["bl2"])[0]
    buf[R_BL3, 0:EMB] = np.asarray(params["bl3"])[0]
    buf[R_WL1:R_WL1 + FEAT, 0:EMB] = np.asarray(params["wl1"])   # zero-padded K
    buf[R_WL2:R_WL2 + EMB, 0:EMB] = np.asarray(params["wl2"])
    buf[R_WL3:R_WL3 + EMB, 0:EMB] = np.asarray(params["wl3"])
    return jnp.asarray(buf)


@jax.jit
def cnn_forward(cand, packed):
    """cand: (B, S) int32 token ids.  Returns (B, EMB) f32."""
    ids = cand.reshape(-1, 1).astype(jnp.int32)                  # (BS, 1)
    return pl.pallas_call(
        cnn_kernel,
        out_shape=jax.ShapeDtypeStruct((cand.shape[0], EMB), jnp.float32),
        in_specs=[
            pl.BlockSpec(memory_space=pltpu.MemorySpace.VMEM),   # token ids
            pl.BlockSpec(memory_space=pltpu.MemorySpace.VMEM),   # packed params
        ],
        out_specs=pl.BlockSpec(memory_space=pltpu.MemorySpace.VMEM),
    )(ids, packed)


# ----------------------- deterministic parameter init -----------------------
def init_params(key):
    ks = jax.random.split(key, 16)
    std = 0.05
    emb_tbl = std * jax.random.normal(ks[0], (VOCAB, EMB), jnp.float32)
    emb_tbl = emb_tbl.at[0].set(0.0)                 # nn.Embedding row 0 zeroed

    def conv_w(k_, ksize):
        # PyTorch Conv2d weight (F, 1, ksize, E) -> kernel layout (ksize, E, F)
        w = std * jax.random.normal(k_, (NFILT, 1, ksize, EMB), jnp.float32)
        return jnp.transpose(w[:, 0, :, :], (1, 2, 0))           # (ksize, E, F)

    params = {
        "embedding": emb_tbl,
        "w1": conv_w(ks[1], 1), "b1": std * jax.random.normal(ks[2], (1, NFILT)),
        "w2": conv_w(ks[3], 2), "b2": std * jax.random.normal(ks[4], (1, NFILT)),
        "w3": conv_w(ks[5], 3), "b3": std * jax.random.normal(ks[6], (1, NFILT)),
        # Linear weights pre-transposed to (in, out); biases kept 2-D (1, out).
        "wl1": std * jax.random.normal(ks[7], (3 * NFILT, EMB)),
        "bl1": std * jax.random.normal(ks[8], (1, EMB)),
        "wl2": std * jax.random.normal(ks[9], (EMB, EMB)),
        "bl2": std * jax.random.normal(ks[10], (1, EMB)),
        "wl3": std * jax.random.normal(ks[11], (EMB, EMB)),
        "bl3": std * jax.random.normal(ks[12], (1, EMB)),
    }
    return jax.tree_util.tree_map(lambda a: a.astype(jnp.float32), params)


# ------------------------- numpy (f64) reference check -----------------------
def reference_forward(cand, params):
    p = {k: np.asarray(v, np.float64) for k, v in params.items()}
    cand = np.asarray(cand)
    emb = p["embedding"][cand]                                   # (B, S, E)

    def conv_pool(w, bias, k):
        outs = []
        for s0 in range(S - k + 1):
            win = emb[:, s0:s0 + k, :]                           # (B, k, E)
            outs.append(np.einsum("bke,kef->bf", win, w) + bias)
        c = np.maximum(np.stack(outs, axis=1), 0.0)              # (B, S-k+1, F)
        return c.max(axis=1)

    feat = np.concatenate([conv_pool(p["w1"], p["b1"], 1),
                           conv_pool(p["w2"], p["b2"], 2),
                           conv_pool(p["w3"], p["b3"], 3)], axis=1)
    h = np.maximum(feat @ p["wl1"] + p["bl1"], 0.0)
    h = np.maximum(h @ p["wl2"] + p["bl2"], 0.0)
    h = np.maximum(h @ p["wl3"] + p["bl3"], 0.0)
    return h


if __name__ == "__main__":
    key = jax.random.PRNGKey(0)
    kp, kc = jax.random.split(key)
    params = init_params(kp)
    packed = pack_params(params)
    cand = jax.random.randint(kc, (B, S), 0, VOCAB, dtype=jnp.int32)

    out = cnn_forward(cand, packed)
    out = jax.block_until_ready(out)

    ref = reference_forward(cand, params)
    np.testing.assert_allclose(np.asarray(out), ref, rtol=5e-3, atol=1e-4)

    assert out.shape == (B, EMB)
    print("KERNEL_OK")
</pallas_src>

<mosaic_0001>
module attributes {stable_mosaic.version = 11 : i64} {
  func.func @cnn_kernel(%arg0: memref<16x1xi32, #tpu.memory_space<vmem>>, %arg1: memref<224x384xf32, #tpu.memory_space<vmem>>, %arg2: memref<2x32xf32, #tpu.memory_space<vmem>>) attributes {dimension_semantics = [], scalar_prefetch = 0 : i64, scratch_operands = 0 : i64, tpu.core_type = #tpu.core_type<tc>} {
    %c0 = arith.constant 0 : index
    %c0_0 = arith.constant 0 : index
    %0 = vector.load %arg0[%c0, %c0_0] : memref<16x1xi32, #tpu.memory_space<vmem>>, vector<16x1xi32>
    %1 = tpu.iota {dimensions = array<i32: 1>} : vector<16x24xi32>
    %2 = vector.broadcast %0 : vector<16x1xi32> to vector<16x24xi32>
    %3 = arith.cmpi eq, %1, %2 : vector<16x24xi32>
    %4 = arith.extui %3 : vector<16x24xi1> to vector<16x24xi32>
    %5 = arith.sitofp %4 : vector<16x24xi32> to vector<16x24xf32>
    %c0_1 = arith.constant 0 : index
    %c0_2 = arith.constant 0 : index
    %6 = vector.load %arg1[%c0_1, %c0_2] : memref<224x384xf32, #tpu.memory_space<vmem>>, vector<24x384xf32>
    %cst = arith.constant dense<0.000000e+00> : vector<16x384xf32>
    %7 = tpu.matmul %5, %6, %cst {dimension_numbers = #tpu.dot_dimension_numbers<[1], [0], [0], [1], [0, 0, 1, 1], [], []>} : vector<16x24xf32>, vector<24x384xf32>, vector<16x384xf32> -> vector<16x384xf32>
    %8 = vector.extract_strided_slice %7 {offsets = [0, 128], sizes = [16, 128], strides = [1, 1]} : vector<16x384xf32> to vector<16x128xf32>
    %c15_i32 = arith.constant 15 : i32
    %9 = tpu.dynamic_rotate %8 by %c15_i32 dim 0 : vector<16x128xf32>, i32 -> vector<16x128xf32>
    %10 = vector.extract_strided_slice %7 {offsets = [0, 256], sizes = [16, 128], strides = [1, 1]} : vector<16x384xf32> to vector<16x128xf32>
    %c14_i32 = arith.constant 14 : i32
    %11 = tpu.dynamic_rotate %10 by %c14_i32 dim 0 : vector<16x128xf32>, i32 -> vector<16x128xf32>
    %12 = vector.extract_strided_slice %7 {offsets = [0, 0], sizes = [16, 128], strides = [1, 1]} : vector<16x384xf32> to vector<16x128xf32>
    %13 = arith.addf %12, %9 : vector<16x128xf32>
    %14 = arith.addf %13, %11 : vector<16x128xf32>
    %c24 = arith.constant 24 : index
    %c0_3 = arith.constant 0 : index
    %15 = vector.load %arg1[%c24, %c0_3] : memref<224x384xf32, #tpu.memory_space<vmem>>, vector<1x128xf32>
    %16 = vector.broadcast %15 : vector<1x128xf32> to vector<16x128xf32>
    %17 = arith.addf %14, %16 : vector<16x128xf32>
    %cst_4 = arith.constant 0.000000e+00 : f32
    %18 = vector.broadcast %cst_4 : f32 to vector<16x128xf32>
    %19 = arith.maximumf %17, %18 : vector<16x128xf32>
    %20 = tpu.iota {dimensions = array<i32: 1>} : vector<16x128xi32>
    %21 = tpu.iota {dimensions = array<i32: 0>} : vector<16x128xi32>
    %c4_i32 = arith.constant 4 : i32
    %22 = vector.broadcast %c4_i32 : i32 to vector<16x128xi32>
    %23 = arith.shrsi %20, %22 : vector<16x128xi32>
    %c7_i32 = arith.constant 7 : i32
    %24 = vector.broadcast %c7_i32 : i32 to vector<16x128xi32>
    %25 = arith.subi %24, %23 : vector<16x128xi32>
    %c7_i32_5 = arith.constant 7 : i32
    %26 = vector.broadcast %c7_i32_5 : i32 to vector<16x128xi32>
    %27 = arith.andi %21, %26 : vector<16x128xi32>
    %28 = arith.cmpi sle, %27, %25 : vector<16x128xi32>
    %cst_6 = arith.constant 0.000000e+00 : f32
    %29 = vector.broadcast %cst_6 : f32 to vector<16x128xf32>
    %30 = arith.select %28, %19, %29 : vector<16x128xi1>, vector<16x128xf32>
    %31 = vector.extract_strided_slice %30 {offsets = [0, 0], sizes = [8, 128], strides = [1, 1]} : vector<16x128xf32> to vector<8x128xf32>
    %cst_7 = arith.constant dense<0xFF800000> : vector<128xf32>
    %32 = vector.multi_reduction <maximumf>, %31, %cst_7 [0] : vector<8x128xf32> to vector<128xf32>
    %33 = vector.shape_cast %32 : vector<128xf32> to vector<1x128xf32>
    %34 = vector.extract_strided_slice %30 {offsets = [8, 0], sizes = [8, 128], strides = [1, 1]} : vector<16x128xf32> to vector<8x128xf32>
    %cst_8 = arith.constant dense<0xFF800000> : vector<128xf32>
    %35 = vector.multi_reduction <maximumf>, %34, %cst_8 [0] : vector<8x128xf32> to vector<128xf32>
    %36 = vector.shape_cast %35 : vector<128xf32> to vector<1x128xf32>
    %37 = tpu.concatenate %33, %36 in 0 : vector<1x128xf32>, vector<1x128xf32> -> vector<2x128xf32>
    %c32 = arith.constant 32 : index
    %c0_9 = arith.constant 0 : index
    %38 = vector.load %arg1[%c32, %c0_9] : memref<224x384xf32, #tpu.memory_space<vmem>>, vector<128x32xf32>
    %c160 = arith.constant 160 : index
    %c0_10 = arith.constant 0 : index
    %39 = vector.load %arg1[%c160, %c0_10] : memref<224x384xf32, #tpu.memory_space<vmem>>, vector<32x32xf32>
    %c192 = arith.constant 192 : index
    %c0_11 = arith.constant 0 : index
    %40 = vector.load %arg1[%c192, %c0_11] : memref<224x384xf32, #tpu.memory_space<vmem>>, vector<32x32xf32>
    %c25 = arith.constant 25 : index
    %c0_12 = arith.constant 0 : index
    %41 = vector.load %arg1[%c25, %c0_12] : memref<224x384xf32, #tpu.memory_space<vmem>>, vector<1x32xf32>
    %c26 = arith.constant 26 : index
    %c0_13 = arith.constant 0 : index
    %42 = vector.load %arg1[%c26, %c0_13] : memref<224x384xf32, #tpu.memory_space<vmem>>, vector<1x32xf32>
    %c27 = arith.constant 27 : index
    %c0_14 = arith.constant 0 : index
    %43 = vector.load %arg1[%c27, %c0_14] : memref<224x384xf32, #tpu.memory_space<vmem>>, vector<1x32xf32>
    %cst_15 = arith.constant dense<0.000000e+00> : vector<2x32xf32>
    %44 = tpu.matmul %37, %38, %cst_15 {dimension_numbers = #tpu.dot_dimension_numbers<[1], [0], [0], [1], [0, 0, 1, 1], [], []>} : vector<2x128xf32>, vector<128x32xf32>, vector<2x32xf32> -> vector<2x32xf32>
    %45 = vector.broadcast %41 : vector<1x32xf32> to vector<2x32xf32>
    %46 = arith.addf %44, %45 : vector<2x32xf32>
    %cst_16 = arith.constant 0.000000e+00 : f32
    %47 = vector.broadcast %cst_16 : f32 to vector<2x32xf32>
    %48 = arith.maximumf %46, %47 : vector<2x32xf32>
    %cst_17 = arith.constant dense<0.000000e+00> : vector<2x32xf32>
    %49 = tpu.matmul %48, %39, %cst_17 {dimension_numbers = #tpu.dot_dimension_numbers<[1], [0], [0], [1], [0, 0, 1, 1], [], []>} : vector<2x32xf32>, vector<32x32xf32>, vector<2x32xf32> -> vector<2x32xf32>
    %50 = vector.broadcast %42 : vector<1x32xf32> to vector<2x32xf32>
    %51 = arith.addf %49, %50 : vector<2x32xf32>
    %cst_18 = arith.constant 0.000000e+00 : f32
    %52 = vector.broadcast %cst_18 : f32 to vector<2x32xf32>
    %53 = arith.maximumf %51, %52 : vector<2x32xf32>
    %cst_19 = arith.constant dense<0.000000e+00> : vector<2x32xf32>
    %54 = tpu.matmul %53, %40, %cst_19 {dimension_numbers = #tpu.dot_dimension_numbers<[1], [0], [0], [1], [0, 0, 1, 1], [], []>} : vector<2x32xf32>, vector<32x32xf32>, vector<2x32xf32> -> vector<2x32xf32>
    %55 = vector.broadcast %43 : vector<1x32xf32> to vector<2x32xf32>
    %56 = arith.addf %54, %55 : vector<2x32xf32>
    %cst_20 = arith.constant 0.000000e+00 : f32
    %57 = vector.broadcast %cst_20 : f32 to vector<2x32xf32>
    %58 = arith.maximumf %56, %57 : vector<2x32xf32>
    %c0_21 = arith.constant 0 : index
    %c0_22 = arith.constant 0 : index
    %59 = vector.load %arg2[%c0_21, %c0_22] : memref<2x32xf32, #tpu.memory_space<vmem>>, vector<2x32xf32>
    tpu.vector_store %arg2[%c0_21, %c0_22], %58 {strides = array<i32>} : memref<2x32xf32, #tpu.memory_space<vmem>>, vector<2x32xf32>,
    return
  }
}

</mosaic_0001>

<bundles_post_ra>
// kernel: cnn_forward.1
= control target key start
LH: loop header
LB: loop body
LE: loop exit
PB: predicated region body
PF: predicated region fallthrough
CT: control target
= control target key end

     0   :  { %7 = vsyncpa [#allocation3], 0  ;;  %s809_s0 = inlined_call_operand.vmem [shape: s32[16,1], index: 0, kind: input, shape index: {}]   ;;  %s810_s1 = inlined_call_operand.hbm [shape: f32[224,384], index: 1, kind: input, shape index: {}]   ;;  %s811_s2 = inlined_call_operand.hbm [shape: f32[2,32], index: 2, kind: output, shape index: {}]  }
   0x1   :  { %8 = vsyncpa [#allocation4], 0  ;;  %s725_s9 = smov [#allocation2]   ;;  %s677_s13 = scalar_lea.hbm %s810_s1, 10752 }
   0x2   :  { %s16_s10 = sshll.u32 %s725_s9, 4  ;;  %p678_p0 = scmp.ne.s32.totalorder %s810_s1, %s677_s13  ;;  %s17_s10 = int_to_ptr.vmem [resolvable:$true] %s16_s10 }
   0x3   :  { %p681_p1 = scmp.lt.u32.totalorder %s677_s13, %s810_s1 }
   0x5   :  { %p683_p2 = pnand %p681_p1, %p678_p0 }
   0x7   :  { %686 = shalt.err (!%p683_p2)
}
   0x8   :  { %s687_s18 = scalar_lea.vmem %s17_s10, 10752  ;;  %p692_p4 = scmp.lt.s32.totalorder %s17_s10, %s17_s10 }
   0x9   :  { %p688_p3 = scmp.ne.s32.totalorder %s17_s10, %s687_s18  ;;  %p693_p5 = scmp.lt.s32.totalorder %s687_s18, %s687_s18 }
   0xb   :  { %p694_p6 = por %p693_p5, %p692_p4 }
   0xd   :  { %p695_p7 = pnand %p694_p6, %p688_p3 }
   0xf   :  { %698 = shalt.err (!%p695_p7)
}
  0x10   :  { %s726_s19 = smov 384   ;;  %s727_s20 = smov 24  }
  0x11   :  { %22 = dma.hbm_to_vmem [thread:$0]  %s810_s1, 10752, %s17_s10, [#allocation3], %s726_s19, %s726_s19, %s727_s20  }
  0x12   :  { %721 = dma.done.wait [#allocation3], 10752  }
  0x13   :  { %722 = vsyncadd [#allocation3], 4294956544  ;;  %v728_v0 = vmov 0   ;;  %v729_v1 = vmov 0.0   ;;  %v26_v2 = vld [vmem:[%s809_s0] sm:$0xff]  ;;  %v43_v3 = vld [vmem:[#allocation2 + $0x8] sm:$0xff]  ;;  %v28_v15 = vlaneseq }
  0x14   :  { %676 = vset.pattern.permute.xlu0 %v728_v0  ;;  %122 = vmatprep.mubr.f32.mxu1 %v729_v1  ;;  %v46_v4 = vld [vmem:[#allocation2 + $0x20] sm:$0xff]  ;;  %v45_v6 = vld [vmem:[#allocation2 + $0x18] sm:$0xff]  ;;  %v27_v7 = vld [vmem:[%s809_s0 + $0x8] sm:$0xff]  ;;  %vm51_vm0 = vcmask 195584   ;;  %v730_v25 = vmov 0.0|0.0   ;;  %vm731_vm3 = vmmov 0  }
  0x15   :  { %31 = vperm.xlu0 %676, %v26_v2   ;;  %v42_v5 = vld [vmem:[#allocation2] sm:$0xff]  ;;  %v624_v8 = vpack.c.bf16 %v46_v4, %v43_v3  ;;  %v49_v10 = vld [vmem:[#allocation2 + $0x38] sm:$0xff]  ;;  %v44_v11 = vld [vmem:[#allocation2 + $0x10] sm:$0xff]  ;;  %v768_v16 = vand.u32 127, %v28_v15  ;;  %632 = vmatprep.subr.bf16.mxu0 %v730_v25  ;;  %v213_v51 = vshrl.u32 %v28_v15, 7  ;;  %vm252_vm8 = vcmask 1040384  }
  0x16   :  { %v626_v9 = vpack.c.bf16 %v45_v6, %v42_v5  ;;  %v47_v12 = vld [vmem:[#allocation2 + $0x28] sm:$0xff]  ;;  %v48_v13 = vld [vmem:[#allocation2 + $0x30] sm:$0xff]  ;;  %v50_v19 = vld [vmem:[#allocation2 + $0x40] sm:$0xff]  ;;  %599 = vmatprep.mubr.msk.f32.mxu0 %vm731_vm3, %v729_v1  ;;  %vm352_vm9 = vcmask 261120   ;;  %s732_s0 = smov [#allocation5]   ;;  %vm501_vm10 = vcmask 254976  }
  0x17   :  { %625 = vmatprep.subr.bf16.mxu1 %v624_v8  ;;  %v628_v14 = vpack.c.bf16 %v47_v12, %v44_v11  ;;  %v254_v22 = vld [vmem:[#allocation2 + $0x60] sm:$0xff]  ;;  %v255_v23 = vld [vmem:[#allocation2 + $0x78] sm:$0xff]  ;;  %v256_v26 = vld [vmem:[#allocation2 + $0x90] sm:$0xff]  ;;  %vm214_vm4 = vcmp.lt.s32.totalorder %v213_v51, 7  ;;  %v232_v57 = vshra.s32 %v768_v16, 4  ;;  %v231_v61 = vadd.s32 8, %v213_v51 }
  0x18   :  { %627 = vmatpush1.bf16.msra.mxu1 %v626_v9  ;;  %v633_v24 = vpack.c.bf16 %v255_v23, %v254_v22  ;;  %v257_v27 = vld [vmem:[#allocation2 + $0xa8] sm:$0xff]  ;;  %v258_v29 = vld [vmem:[#allocation2 + $0xc0] sm:$0xff]  ;;  %v259_v30 = vld [vmem:[#allocation2 + $0xd8] sm:$0xff]  ;;  %vm219_vm5 = vcmp.lt.s32.totalorder %v213_v51, 6  ;;  %v234_v8 = vand.u32 7, %v213_v51  ;;  %s509_s1 = sshll.u32 %s732_s0, 4  ;;  %s510_s1 = int_to_ptr.vmem [resolvable:$true] %s509_s1 }
  0x19   :  { %34 = vperm.xlu0 %676, %v27_v7   ;;  %62 = vmatprep.subr.mxu1 %v49_v10  ;;  %v636_v28 = vpack.c.bf16 %v257_v27, %v256_v26  ;;  %v639_v31 = vpack.c.bf16 %v259_v30, %v258_v29  ;;  %v260_v32 = vld [vmem:[#allocation2 + $0xf0] sm:$0xff]  ;;  %v261_v33 = vld [vmem:[#allocation2 + $0x108] sm:$0xff]  ;;  %v262_v35 = vld [vmem:[#allocation2 + $0x120] sm:$0xff]  ;;  %v233_v4 = vsub.s32 7, %v232_v57  ;;  %v235_v9 = vand.u32 7, %v231_v61  ;;  %s699_s27 = scalar_lea.vmem %s510_s1, 32  ;;  %p704_p9 = scmp.lt.s32.totalorder %s510_s1, %s510_s1 }
  0x1a   :  { %634 = vmatpush3.bf16.msra.mxu0 %v633_v24  ;;  %v642_v34 = vpack.c.bf16 %v261_v33, %v260_v32  ;;  %v263_v36 = vld [vmem:[#allocation2 + $0x138] sm:$0xff]  ;;  %v264_v38 = vld [vmem:[#allocation2 + $0x150] sm:$0xff]  ;;  %v265_v39 = vld [vmem:[#allocation2 + $0x168] sm:$0xff]  ;;  %p700_p8 = scmp.ne.s32.totalorder %s510_s1, %s699_s27  ;;  %p705_p10 = scmp.lt.s32.totalorder %s699_s27, %s699_s27 }
  0x1b   :  { %635 = vmatprep.subr.bf16.mxu0 %v730_v25  ;;  %v645_v37 = vpack.c.bf16 %v263_v36, %v262_v35  ;;  %v648_v40 = vpack.c.bf16 %v265_v39, %v264_v38  ;;  %v266_v41 = vld [vmem:[#allocation2 + $0x180] sm:$0xff]  ;;  %v267_v42 = vld [vmem:[#allocation2 + $0x198] sm:$0xff]  ;;  %v268_v44 = vld [vmem:[#allocation2 + $0x1b0] sm:$0xff]  ;;  %vm236_vm6 = vcmp.le.s32.totalorder %v234_v8, %v233_v4  ;;  %vm237_vm7 = vcmp.le.s32.totalorder %v235_v9, %v233_v4 }
  0x1c   :  { %63 = vmatpush1.msra.mxu1 %v48_v13  ;;  %v651_v43 = vpack.c.bf16 %v267_v42, %v266_v41  ;;  %v269_v45 = vld [vmem:[#allocation2 + $0x1c8] sm:$0xff]  ;;  %v270_v47 = vld [vmem:[#allocation2 + $0x1e0] sm:$0xff]  ;;  %v271_v48 = vld [vmem:[#allocation2 + $0x1f8] sm:$0xff]  ;;  %p706_p11 = por %p705_p10, %p704_p9 }
  0x1d   :  { %629 = vmatprep.subr.bf16.mxu1 %v628_v14  ;;  %v654_v46 = vpack.c.bf16 %v269_v45, %v268_v44  ;;  %v657_v49 = vpack.c.bf16 %v271_v48, %v270_v47  ;;  %v226_v7 = vld [vmem:[#allocation2 + $0x48] ss:$0 sm:$0xff]  ;;  %v272_v32 = vld [vmem:[#allocation2 + $0x210] sm:$0xff]  ;;  %v278_v35 = vld [vmem:[#allocation2 + $0x49] ss:$0 sm:$0xff] }
  0x1e   :  { %637 = vmatpush3.bf16.msra.mxu0 %v636_v28  ;;  %v273_v33 = vld [vmem:[#allocation2 + $0x228] sm:$0xff]  ;;  %v274_v36 = vld [vmem:[#allocation2 + $0x240] sm:$0xff]  ;;  %p707_p12 = pnand %p706_p11, %p700_p8 }
  0x1f   :  { %638 = vmatprep.subr.bf16.mxu0 %v730_v25  ;;  %v277_v44 = vld [vmem:[#allocation2 + $0x288] sm:$0xff] }
  0x20   :  { %v280_v51 = vld [vmem:[#allocation2 + $0x4b] ss:$0 sm:$0xff] }
  0x22   :  { %640 = vmatpush3.bf16.msra.mxu0 %v639_v31 }
  0x23   :  { %641 = vmatprep.subr.bf16.mxu0 %v730_v25 }
  0x26   :  { %643 = vmatpush3.bf16.msra.mxu0 %v642_v34  ;;  %v660_v34 = vpack.c.bf16 %v273_v33, %v272_v32 }
  0x27   :  { %644 = vmatprep.subr.bf16.mxu0 %v730_v25 }
  0x2a   :  { %646 = vmatpush3.bf16.msra.mxu0 %v645_v37  ;;  %v275_v37 = vld [vmem:[#allocation2 + $0x258] sm:$0xff] }
  0x2b   :  { %647 = vmatprep.subr.bf16.mxu0 %v730_v25  ;;  %v663_v41 = vpack.c.bf16 %v275_v37, %v274_v36 }
  0x2e   :  { %649 = vmatpush3.bf16.msra.mxu0 %v648_v40 }
  0x2f   :  { %650 = vmatprep.subr.bf16.mxu0 %v730_v25 }
  0x32   :  { %652 = vmatpush3.bf16.msra.mxu0 %v651_v43  ;;  %v276_v43 = vld [vmem:[#allocation2 + $0x270] sm:$0xff] }
  0x33   :  { %653 = vmatprep.subr.bf16.mxu0 %v730_v25  ;;  %v666_v45 = vpack.c.bf16 %v277_v44, %v276_v43 }
  0x36   :  { %655 = vmatpush3.bf16.msra.mxu0 %v654_v46  ;;  %v279_v46 = vld [vmem:[#allocation2 + $0x4a] ss:$0 sm:$0xff] }
  0x94   :  { %v32_v17 = vpop.permute.xlu0 %31 }
  0x95   :  { %vm36_vm1 = vcmp.eq.s32.totalorder %v768_v16, %v32_v17 }
  0x96   :  { %v518_v18 = vsel %vm36_vm1, 1.0, %v729_v1 }
  0x97   :  { %520 = vmatmul.mubr.msk.f32.vlgmr.msra.gmra.mrb[0].mxu1 %vm51_vm0, %v518_v18 }
  0x98   :  { %631 = vmatpush3.bf16.msra.mxu1 %v628_v14  ;;  %v35_v20 = vpop.permute.xlu0 %34  ;;  %128 = vmatprep.mubr.f32.mxu1 %v729_v1 }
  0x99   :  { %vm37_vm2 = vcmp.eq.s32.totalorder %v768_v16, %v35_v20  ;;  %562 = vmatprep.subr.mxu1 %v50_v19 }
  0x9a   :  { %v519_v21 = vsel %vm37_vm2, 1.0, %v729_v1 }
  0x9b   :  { %521 = vmatmul.mubr.msk.f32.gmra.mrb[2].mxu1 %vm51_vm0, %v519_v21 }
  0x9c   :  { %563 = vmatpush3.msra.mxu1 %v50_v19  ;;  %564 = vmatprep.mubr.msk.f32.mxu1 %vm51_vm0, %v518_v18 }
  0x9d   :  { %656 = vmatprep.subr.bf16.mxu1 %v730_v25 }
  0x9f   :  { %565 = vmatmul.mubr.msk.f32.vlgmr.msra.gmra.mrb[4].mxu1 %vm51_vm0, %v519_v21 }
  0xa0   :  { %610 = vmatprep.mubr.msk.f32.mxu1 %vm731_vm3, %v729_v1  ;;  %658 = vmatpush3.bf16.msra.mxu1 %v657_v49 }
  0xa1   :  { %659 = vmatprep.subr.bf16.mxu1 %v730_v25 }
  0xa4   :  { %661 = vmatpush3.bf16.msra.mxu1 %v660_v34 }
  0xa5   :  { %662 = vmatprep.subr.bf16.mxu1 %v730_v25 }
 0x16a   :  { %v124_v50 = vpop.f32.mrb[0].mxu1 }
 0x16b   :  { %v126_v52 = vpop.f32.mrb[1].mxu1 }
 0x16c   :  { %v210_v55 = vrot.slane %v126_v52, 1 }
 0x16e   :  { %v130_v53 = vpop.f32.mrb[2].mxu1 }
 0x16f   :  { %v132_v54 = vpop.f32.mrb[3].mxu1 }
 0x170   :  { %v211_v56 = vrot.slane %v132_v54, 1 }
 0x172   :  { %v215_v58 = vsel %vm214_vm4, %v210_v55, %v211_v56  ;;  %v216_v59 = vsel %vm214_vm4, %v211_v56, %v210_v55  ;;  %v566_v60 = vpop.f32.mrb[4].mxu1 }
 0x173   :  { %v222_v62 = vadd.f32 %v215_v58, %v124_v50  ;;  %v223_v63 = vadd.f32 %v216_v59, %v130_v53  ;;  %v218_v0 = vrot.slane %v566_v60, 2  ;;  %v201_v2 = vpop.f32.mrb[5].mxu1 }
 0x174   :  { %v217_v3 = vrot.slane %v201_v2, 2 }
 0x176   :  { %v220_v5 = vsel %vm219_vm5, %v217_v3, %v218_v0  ;;  %v221_v6 = vsel %vm219_vm5, %v218_v0, %v217_v3 }
 0x177   :  { %v224_v10 = vadd.f32 %v222_v62, %v220_v5  ;;  %v225_v11 = vadd.f32 %v223_v63, %v221_v6 }
 0x179   :  { %v227_v12 = vadd.f32 %v226_v7, %v224_v10  ;;  %v228_v13 = vadd.f32 %v226_v7, %v225_v11 }
 0x17b   :  { %v229_v14 = vmax.f32 %v227_v12, 0.0  ;;  %v230_v15 = vmax.f32 %v228_v13, 0.0 }
 0x17d   :  { %v238_v16 = vsel %vm236_vm6, %v229_v14, 0.0  ;;  %v239_v17 = vsel %vm237_vm7, %v230_v15, 0.0 }
 0x17e   :  { %v240_v18 = vrot.slane %v238_v16, 4  ;;  %v246_v19 = vrot.slane %v239_v17, 4 }
 0x180   :  { %v241_v20 = vmax.f32 %v238_v16, %v240_v18  ;;  %v247_v21 = vmax.f32 %v239_v17, %v246_v19 }
 0x182   :  { %v242_v22 = vrot.slane %v241_v20, 2  ;;  %v248_v23 = vrot.slane %v247_v21, 2 }
 0x184   :  { %v243_v24 = vmax.f32 %v241_v20, %v242_v22  ;;  %v249_v26 = vmax.f32 %v247_v21, %v248_v23 }
 0x186   :  { %v244_v27 = vrot.slane %v243_v24, 1  ;;  %v250_v28 = vrot.slane %v249_v26, 1 }
 0x188   :  { %v245_v29 = vmax.f32 %v243_v24, %v244_v27  ;;  %v251_v30 = vmax.f32 %v249_v26, %v250_v28 }
 0x18a   :  { %v253_v31 = vsel %vm252_vm8, %v245_v29, %v251_v30 }
 0x18b   :  { %600 = vmatmul.mubr.f32.vlgmr.msra.gmra.mrb[0].mxu0 %v253_v31 }
 0x25e   :  { %v347_v38 = vpop.f32.mrb[0].mxu0 }
 0x25f   :  { %v348_v39 = vadd.f32 %v347_v38, %v278_v35  ;;  %v601_v40 = vpop.f32.mrb[1].mxu0 }
 0x261   :  { %v351_v42 = vmax.f32 %v348_v39, 0.0 }
 0x263   :  { %611 = vmatmul.mubr.msk.f32.vlgmr.msra.gmra.mrb[6].mxu1 %vm352_vm9, %v351_v42 }
 0x264   :  { %664 = vmatpush3.bf16.msra.mxu1 %v663_v41  ;;  %621 = vmatprep.mubr.msk.f32.mxu1 %vm731_vm3, %v729_v1 }
 0x265   :  { %665 = vmatprep.subr.bf16.mxu1 %v730_v25 }
 0x268   :  { %667 = vmatpush3.bf16.msra.mxu1 %v666_v45 }
 0x336   :  { %v422_v47 = vpop.f32.mrb[6].mxu1 }
 0x337   :  { %v423_v48 = vadd.f32 %v422_v47, %v279_v46  ;;  %v612_v49 = vpop.f32.mrb[7].mxu1 }
 0x339   :  { %v426_v50 = vmax.f32 %v423_v48, 0.0 }
 0x33b   :  { %622 = vmatmul.mubr.msk.f32.vlgmr.msra.gmra.mrb[8].mxu1 %vm352_vm9, %v426_v50 }
 0x40e   :  { %v496_v52 = vpop.f32.mrb[8].mxu1 }
 0x40f   :  { %v497_v53 = vadd.f32 %v496_v52, %v280_v51  ;;  %v623_v54 = vpop.f32.mrb[9].mxu1 }
 0x411   :  { %v500_v1 = vmax.f32 %v497_v53, 0.0 }
 0x413   :  { %502 = vst.msk [vmem:[#allocation5] sm:$0x3] %vm501_vm10, %v500_v1 }
 0x414   :  { %710 = shalt.err (!%p707_p12)
}
 0x415   :  { %s711_s30 = scalar_lea.hbm %s811_s2, 32 }
 0x416   :  { %p712_p13 = scmp.ne.s32.totalorder %s811_s2, %s711_s30  ;;  %p715_p0 = scmp.lt.u32.totalorder %s711_s30, %s811_s2 }
 0x418   :  { %p717_p1 = pnand %p715_p0, %p712_p13 }
 0x41a   :  { %720 = shalt.err (!%p717_p1)
}
 0x41b   :  { %512 = dma.vmem_to_hbm [thread:$0]  %s510_s1, 32, %s811_s2, [#allocation4]  }
 0x41c   :  { %723 = dma.done.wait [#allocation4], 32  }
 0x41d   :  { %724 = vsyncadd [#allocation4], 4294967264 }
 0x41e   :  { %516 = vsyncpa [#allocation3], 1 }
 0x41f   :  { %517 = vsyncpa [#allocation4], 1 }

</bundles_post_ra>
